<compile_context>
chip_gen: v7x
topology: tpu7x:2x2x1
jax: 0.10.0
libtpu: 0.0.40
codegen_flags: <defaults>
</compile_context>

<pallas_src>
import functools
import math

import jax
import jax.numpy as jnp
from jax.experimental import pallas as pl
from jax.experimental.pallas import tpu as pltpu

EPS = 1e-7
_LANE = 128
_SUBLANE = 8
_MAX_TILE = 512
_MAX_BATCH_TILE = 256
_KL_BLOCK = (_SUBLANE, _LANE)            # lane-dense per-(b,j) KL partial block
_KL_BLOCK_ELEMS = _SUBLANE * _LANE


def _round_up(x, m):
    return ((x + m - 1) // m) * m


def _pick_n(output_dim):
    """Padded Dout (multiple of 128) and tile; prefer >= 2 tiles (v7x megacore)."""
    dout_pad = _round_up(output_dim, _LANE)
    for t in (_MAX_TILE, 256, _LANE):
        if dout_pad % t == 0 and dout_pad // t >= 2:
            return dout_pad, t
    for t in (_MAX_TILE, 256, _LANE):
        if dout_pad % t == 0:
            return dout_pad, t
    return dout_pad, _LANE


def _pick_k(input_dim):
    """Padded Din and its tile size (full dim if small, else multiple of 128)."""
    din_pad = _round_up(input_dim, _SUBLANE)
    if din_pad <= _MAX_TILE:
        return din_pad, din_pad
    din_pad = _round_up(input_dim, _LANE)
    for t in (_MAX_TILE, 256, _LANE):
        if din_pad % t == 0:
            return din_pad, t
    return din_pad, _LANE


def _batch_tiling(batch):
    """(b_pad, tb, n_b): batch padded to a multiple of 16 (bf16 packing) and
    tiled at <= 256 rows so VMEM stays bounded on v7x."""
    if batch <= _MAX_BATCH_TILE:
        b_pad = _round_up(max(batch, 16), 16)
        return b_pad, b_pad, 1
    tb = _MAX_BATCH_TILE
    b_pad = _round_up(batch, tb)
    return b_pad, tb, b_pad // tb


def _vmem_limit(*block_shapes):
    """Explicit scoped-VMEM limit: double-buffered f32-sized blocks + headroom,
    clamped so it also fits v7x's 64 MiB per-core VMEM."""
    elems = sum(math.prod(s) for s in block_shapes)
    return int(min(max(2 * 4 * elems + (8 << 20), 16 << 20), 48 << 20))


def _sigmoid(x):
    return 1.0 / (1.0 + jnp.exp(-x))


def _softplus(x):
    # Overflow-safe log(1 + exp(x)).
    return jnp.maximum(x, 0.0) + jnp.log(1.0 + jnp.exp(-jnp.abs(x)))


# --------------------------------------------------------------------------
# Fused KL accumulation (beta + bias + spike), guarded so every term is
# counted exactly once across the (n_b, n_j, n_k) grid (only at b == 0).
# --------------------------------------------------------------------------
def _accumulate_kl(kl_acc, b, j, k, mu_beta, rho_beta_ref, mu_bias_ref,
                   rho_bias_ref, p_logit_ref, sigma_beta, sigma_beta2,
                   *, sigma, p_prior, input_dim, output_dim, tk, tn):
    log_sigma = math.log(sigma)
    inv_two_sigma_sq = 1.0 / (2.0 * sigma * sigma)

    @pl.when(b == 0)
    def _():
        sb = _softplus(rho_beta_ref[...]) if sigma_beta is None else sigma_beta
        sb2 = sb * sb if sigma_beta2 is None else sigma_beta2
        rows = jax.lax.broadcasted_iota(jnp.int32, mu_beta.shape, 0) + k * tk
        cols = jax.lax.broadcasted_iota(jnp.int32, mu_beta.shape, 1) + j * tn
        mask = jnp.logical_and(rows < input_dim, cols < output_dim)
        kl_acc[0] += jnp.sum(jnp.where(
            mask,
            (sb2 + mu_beta * mu_beta) * inv_two_sigma_sq
            - jnp.log(sb + EPS) + log_sigma - 0.5,
            0.0))

    @pl.when(jnp.logical_and(b == 0, k == 0))   # once per Dout tile: bias KL
    def _():
        mu_bias = mu_bias_ref[...]                                 # (1, tn)
        sbias = _softplus(rho_bias_ref[...])
        bcols = jax.lax.broadcasted_iota(jnp.int32, mu_bias.shape, 1) + j * tn
        kl_acc[0] += jnp.sum(jnp.where(
            bcols < output_dim,
            (sbias * sbias + mu_bias * mu_bias) * inv_two_sigma_sq
            - jnp.log(sbias + EPS) + log_sigma - 0.5,
            0.0))

    @pl.when(jnp.logical_and(b == 0, j == 0))   # once per Din tile: spike KL
    def _():
        p = _sigmoid(p_logit_ref[...])                             # (1, tk)
        lanes = jax.lax.broadcasted_iota(jnp.int32, p.shape, 1) + k * tk
        kl_sp = (p * jnp.log(p + EPS) + (1.0 - p) * jnp.log(1.0 - p + EPS)
                 - (p * math.log(p_prior + EPS)
                    + (1.0 - p) * math.log(1.0 - p_prior + EPS)))
        kl_acc[0] += jnp.sum(jnp.where(lanes < input_dim, kl_sp, 0.0))


def _write_kl_block(kl_ref, kl_acc, b):
    kl_val = jnp.where(b == 0, kl_acc[0], 0.0)
    kl_ref[...] = (jnp.zeros(kl_ref.shape, jnp.float32)
                   + kl_val * (1.0 / _KL_BLOCK_ELEMS))


# --------------------------------------------------------------------------
# Forward kernels. Grid: (batch tiles [parallel], Dout tiles [parallel],
#                          Din tiles [arbitrary, innermost reduction]).
# --------------------------------------------------------------------------
def _fwd_train_kernel(x_ref, mu_beta_ref, rho_beta_ref, mu_bias_ref,
                      rho_bias_ref, p_logit_ref, unif_ref, eps_ref,
                      out_ref, kl_ref, mean_acc, var_acc, kl_acc,
                      *, sigma, p_prior, input_dim, output_dim, tk, tn):
    b = pl.program_id(0)
    j = pl.program_id(1)
    k = pl.program_id(2)

    @pl.when(k == 0)
    def _():
        mean_acc[...] = jnp.zeros_like(mean_acc)
        var_acc[...] = jnp.zeros_like(var_acc)
        kl_acc[0] = 0.0

    # softplus(rho_beta)^2 computed inline on the weight tile (no HBM table).
    mu_beta = mu_beta_ref[...]                                     # (tk, tn) f32
    sigma_beta = _softplus(rho_beta_ref[...])
    sigma_beta2 = sigma_beta * sigma_beta

    # Hard-concrete relaxation of the spike gate; logit(sigmoid(z)) == z, so
    # p_logit is used directly instead of log(p+eps) - log(1-p+eps).
    temp = 0.1
    limit_left, limit_right = -0.1, 1.1
    u = unif_ref[...]                                              # (1, tk) f32
    s = (p_logit_ref[...] + jnp.log(u + EPS) - jnp.log(1.0 - u + EPS)) / temp
    keep_prob = jnp.clip(_sigmoid(s) * (limit_right - limit_left) + limit_left,
                         0.0, 1.0)
    # TODO(synk): the PyTorch module also sets self.num_features = sum(keep_prob)
    # as a side attribute (not part of the returned values); not emitted here.

    xk = x_ref[...] * keep_prob.astype(jnp.bfloat16)               # (tb, tk) bf16
    mean_acc[...] += jnp.dot(xk, mu_beta.astype(jnp.bfloat16),
                             preferred_element_type=jnp.float32)
    var_acc[...] += jnp.dot(xk * xk, sigma_beta2.astype(jnp.bfloat16),
                            preferred_element_type=jnp.float32)

    _accumulate_kl(kl_acc, b, j, k, mu_beta, rho_beta_ref, mu_bias_ref,
                   rho_bias_ref, p_logit_ref, sigma_beta, sigma_beta2,
                   sigma=sigma, p_prior=p_prior, input_dim=input_dim,
                   output_dim=output_dim, tk=tk, tn=tn)

    @pl.when(k == pl.num_programs(2) - 1)
    def _():
        sigma_bias = _softplus(rho_bias_ref[...])                  # (1, tn)
        mean_out = mean_acc[...] + mu_bias_ref[...]
        sigma_out = jnp.sqrt(var_acc[...] + sigma_bias * sigma_bias)
        out_ref[...] = mean_out + sigma_out * eps_ref[...].astype(jnp.float32)
        _write_kl_block(kl_ref, kl_acc, b)


def _fwd_eval_kernel(x_ref, mu_beta_ref, rho_beta_ref, mu_bias_ref,
                     rho_bias_ref, p_logit_ref, out_ref, kl_ref,
                     acc, kl_acc, *, sigma, p_prior, input_dim, output_dim,
                     tk, tn):
    b = pl.program_id(0)
    j = pl.program_id(1)
    k = pl.program_id(2)

    @pl.when(k == 0)
    def _():
        acc[...] = jnp.zeros_like(acc)
        kl_acc[0] = 0.0

    mu_beta = mu_beta_ref[...]                                     # (tk, tn) f32
    p = _sigmoid(p_logit_ref[...])                                 # (1, tk)
    xp = x_ref[...] * p.astype(jnp.bfloat16)                       # (tb, tk) bf16
    acc[...] += jnp.dot(xp, mu_beta.astype(jnp.bfloat16),
                        preferred_element_type=jnp.float32)

    # sigma_beta only needed for KL -> softplus happens inside the b==0 guard.
    _accumulate_kl(kl_acc, b, j, k, mu_beta, rho_beta_ref, mu_bias_ref,
                   rho_bias_ref, p_logit_ref, None, None,
                   sigma=sigma, p_prior=p_prior, input_dim=input_dim,
                   output_dim=output_dim, tk=tk, tn=tn)

    @pl.when(k == pl.num_programs(2) - 1)
    def _():
        out_ref[...] = acc[...] + mu_bias_ref[...]
        _write_kl_block(kl_ref, kl_acc, b)


# --------------------------------------------------------------------------
# Layer wrapper
# --------------------------------------------------------------------------
class SpikeslabARDLayer:
    """JAX / Pallas port of SpikeslabARD_layer (forward only)."""

    def __init__(self, input_dim, output_dim, slab_prob=0.1, sigma=0.6, *,
                 key=jax.random.PRNGKey(0)):
        self.input_dim = int(input_dim)
        self.output_dim = int(output_dim)
        self.sigma = float(sigma)
        self.p_prior = float(slab_prob)

        scale = 1.0 * math.sqrt(6.0 / (input_dim + output_dim))
        k = jax.random.split(key, 4)
        self.mu_beta = jax.random.uniform(k[0], (input_dim, output_dim),
                                          jnp.float32, -scale, scale)
        self.rho_beta = jax.random.uniform(k[1], (input_dim, output_dim),
                                           jnp.float32, -4.0, -2.0)
        self.mu_bias = jax.random.uniform(k[2], (output_dim,),
                                          jnp.float32, -scale, scale)
        self.rho_bias = jax.random.uniform(k[3], (output_dim,),
                                           jnp.float32, -4.0, -2.0)
        # init_min == init_max == 0.5  ->  logit(0.5) == 0.0
        self.p_logit = jnp.zeros((input_dim,), jnp.float32)

        self.dout_pad, self.tn = _pick_n(self.output_dim)
        self.din_pad, self.tk = _pick_k(self.input_dim)

        # Pre-padded parameter masters (padded once, reused every call).
        f32 = jnp.float32
        din, dout = self.input_dim, self.output_dim
        self.mu_beta_p = jnp.zeros((self.din_pad, self.dout_pad), f32
                                   ).at[:din, :dout].set(self.mu_beta)
        self.rho_beta_p = jnp.zeros((self.din_pad, self.dout_pad), f32
                                    ).at[:din, :dout].set(self.rho_beta)
        self.mu_bias_p = jnp.zeros((1, self.dout_pad), f32
                                   ).at[0, :dout].set(self.mu_bias)
        self.rho_bias_p = jnp.zeros((1, self.dout_pad), f32
                                    ).at[0, :dout].set(self.rho_bias)
        self.p_logit_p = jnp.zeros((1, self.din_pad), f32
                                   ).at[0, :din].set(self.p_logit)

    # ---- forward ------------------------------------------------------------
    def __call__(self, x, training, *, key=None):
        batch = x.shape[0]
        din, dout = self.input_dim, self.output_dim
        din_pad, tk = self.din_pad, self.tk
        dout_pad, tn = self.dout_pad, self.tn
        b_pad, tb, n_b = _batch_tiling(batch)
        n_j, n_k = dout_pad // tn, din_pad // tk
        f32, bf16 = jnp.float32, jnp.bfloat16

        x_p = jnp.zeros((b_pad, din_pad), bf16
                        ).at[:batch, :din].set(x.astype(bf16))

        out_shapes = (
            jax.ShapeDtypeStruct((b_pad, dout_pad), f32),
            jax.ShapeDtypeStruct((n_b, n_j) + _KL_BLOCK, f32),
        )
        out_specs = (
            pl.BlockSpec((tb, tn), lambda b, j, k: (b, j)),
            pl.BlockSpec((1, 1) + _KL_BLOCK, lambda b, j, k: (b, j, 0, 0)),
        )
        semantics = ("parallel", "parallel", "arbitrary")
        common_kw = dict(sigma=self.sigma, p_prior=self.p_prior,
                         input_dim=din, output_dim=dout, tk=tk, tn=tn)

        if training:
            if key is None:
                raise ValueError("training=True requires an explicit PRNG key")
            ku, ke = jax.random.split(key)
            # TODO(synk): unif/epsilon could be drawn in-kernel via
            # pltpu.prng_seed + pltpu.prng_random_bits to remove these HBM
            # streams entirely; kept host-side (epsilon in bf16) for robustness.
            unif = jax.random.uniform(ku, (1, din), f32)
            unif_p = jnp.zeros((1, din_pad), f32).at[:, :din].set(unif)
            epsilon = jax.random.normal(ke, (batch, dout), f32)
            eps_p = jnp.zeros((b_pad, dout_pad), bf16
                              ).at[:batch, :dout].set(epsilon.astype(bf16))

            cost = pl.CostEstimate(
                flops=4 * b_pad * din_pad * dout_pad,
                transcendentals=2 * n_b * din_pad * dout_pad,
                bytes_accessed=(n_j * b_pad * din_pad * 2
                                + n_b * din_pad * dout_pad * 8
                                + b_pad * dout_pad * (2 + 4)))

            out_pad, kl_parts = pl.pallas_call(
                functools.partial(_fwd_train_kernel, **common_kw),
                out_shape=out_shapes,
                grid_spec=pltpu.PrefetchScalarGridSpec(
                    num_scalar_prefetch=0,
                    grid=(n_b, n_j, n_k),
                    in_specs=[
                        pl.BlockSpec((tb, tk), lambda b, j, k: (b, k)),   # x (bf16)
                        pl.BlockSpec((tk, tn), lambda b, j, k: (k, j)),   # mu_beta
                        pl.BlockSpec((tk, tn), lambda b, j, k: (k, j)),   # rho_beta
                        pl.BlockSpec((1, tn), lambda b, j, k: (0, j)),    # mu_bias
                        pl.BlockSpec((1, tn), lambda b, j, k: (0, j)),    # rho_bias
                        pl.BlockSpec((1, tk), lambda b, j, k: (0, k)),    # p_logit
                        pl.BlockSpec((1, tk), lambda b, j, k: (0, k)),    # unif
                        pl.BlockSpec((tb, tn), lambda b, j, k: (b, j)),   # eps (bf16)
                    ],
                    out_specs=out_specs,
                    scratch_shapes=[pltpu.VMEM((tb, tn), f32),
                                    pltpu.VMEM((tb, tn), f32),
                                    pltpu.SMEM((1,), f32)],
                ),
                compiler_params=pltpu.CompilerParams(
                    dimension_semantics=semantics,
                    vmem_limit_bytes=_vmem_limit(
                        (tb, tk), (tk, tn), (tk, tn), (1, tn), (1, tn),
                        (1, tk), (1, tk), (tb, tn), (tb, tn),
                        (tb, tn), (tb, tn), _KL_BLOCK)),
                cost_estimate=cost,
            )(x_p, self.mu_beta_p, self.rho_beta_p, self.mu_bias_p,
              self.rho_bias_p, self.p_logit_p, unif_p, eps_p)
        else:
            cost = pl.CostEstimate(
                flops=2 * b_pad * din_pad * dout_pad,
                transcendentals=2 * din_pad * dout_pad,
                bytes_accessed=(n_j * b_pad * din_pad * 2
                                + n_b * din_pad * dout_pad * 8
                                + b_pad * dout_pad * 4))

            out_pad, kl_parts = pl.pallas_call(
                functools.partial(_fwd_eval_kernel, **common_kw),
                out_shape=out_shapes,
                grid_spec=pltpu.PrefetchScalarGridSpec(
                    num_scalar_prefetch=0,
                    grid=(n_b, n_j, n_k),
                    in_specs=[
                        pl.BlockSpec((tb, tk), lambda b, j, k: (b, k)),   # x (bf16)
                        pl.BlockSpec((tk, tn), lambda b, j, k: (k, j)),   # mu_beta
                        pl.BlockSpec((tk, tn), lambda b, j, k: (k, j)),   # rho_beta
                        pl.BlockSpec((1, tn), lambda b, j, k: (0, j)),    # mu_bias
                        pl.BlockSpec((1, tn), lambda b, j, k: (0, j)),    # rho_bias
                        pl.BlockSpec((1, tk), lambda b, j, k: (0, k)),    # p_logit
                    ],
                    out_specs=out_specs,
                    scratch_shapes=[pltpu.VMEM((tb, tn), f32),
                                    pltpu.SMEM((1,), f32)],
                ),
                compiler_params=pltpu.CompilerParams(
                    dimension_semantics=semantics,
                    vmem_limit_bytes=_vmem_limit(
                        (tb, tk), (tk, tn), (tk, tn), (1, tn), (1, tn),
                        (1, tk), (tb, tn), (tb, tn), _KL_BLOCK)),
                cost_estimate=cost,
            )(x_p, self.mu_beta_p, self.rho_beta_p, self.mu_bias_p,
              self.rho_bias_p, self.p_logit_p)

        kl = jnp.sum(kl_parts)
        return out_pad[:batch, :dout], kl


if __name__ == "__main__":
    batch, input_dim, output_dim = 8, 32, 32
    root = jax.random.PRNGKey(0)
    k_param, k_x, k_noise = jax.random.split(root, 3)

    layer = SpikeslabARDLayer(input_dim, output_dim, slab_prob=0.1, sigma=0.6,
                              key=k_param)
    x = jax.random.normal(k_x, (batch, input_dim), jnp.float32)

    out_train, kl_train = layer(x, training=True, key=k_noise)
    out_eval, kl_eval = layer(x, training=False)
    jax.block_until_ready((out_train, kl_train, out_eval, kl_eval))

    assert out_train.shape == (batch, output_dim)
    assert out_eval.shape == (batch, output_dim)
    assert kl_train.shape == () and kl_eval.shape == ()
    assert bool(jnp.all(jnp.isfinite(out_train)))
    assert bool(jnp.all(jnp.isfinite(out_eval)))

    # Pure-JAX reference.
    p = jax.nn.sigmoid(layer.p_logit)
    sigma_beta = jax.nn.softplus(layer.rho_beta)
    sigma_bias = jax.nn.softplus(layer.rho_bias)
    log_s = math.log(layer.sigma)
    two_s2 = 2.0 * layer.sigma ** 2
    ref_kl = (jnp.sum((sigma_beta ** 2 + layer.mu_beta ** 2) / two_s2
                      - jnp.log(sigma_beta + EPS) + log_s - 0.5)
              + jnp.sum((sigma_bias ** 2 + layer.mu_bias ** 2) / two_s2
                        - jnp.log(sigma_bias + EPS) + log_s - 0.5)
              + jnp.sum(p * jnp.log(p + EPS)
                        + (1.0 - p) * jnp.log(1.0 - p + EPS))
              - jnp.sum(p * math.log(layer.p_prior + EPS)
                        + (1.0 - p) * math.log(1.0 - layer.p_prior + EPS)))

    # Eval path.
    ref_eval = (x * p) @ layer.mu_beta + layer.mu_bias
    assert bool(jnp.allclose(out_eval, ref_eval, rtol=5e-2, atol=5e-2)), \
        "eval output mismatch vs reference"
    assert bool(jnp.allclose(kl_eval, ref_kl, rtol=2e-3, atol=1e-2)), \
        "eval KL mismatch vs reference"
    assert bool(jnp.allclose(kl_train, ref_kl, rtol=2e-3, atol=1e-2)), \
        "train KL mismatch vs reference"

    # Train path with the same unif/epsilon draws as the wrapper.
    ku, ke = jax.random.split(k_noise)
    unif = jax.random.uniform(ku, (1, input_dim), jnp.float32)
    epsilon = jax.random.normal(ke, (batch, output_dim), jnp.float32)
    s_ref = (jnp.log(p + EPS) - jnp.log(1.0 - p + EPS)
             + jnp.log(unif + EPS) - jnp.log(1.0 - unif + EPS)) / 0.1
    keep_prob = jnp.clip(jax.nn.sigmoid(s_ref) * 1.2 - 0.1, 0.0, 1.0)
    xk = x * keep_prob
    ref_mean = xk @ layer.mu_beta + layer.mu_bias
    ref_sig = jnp.sqrt((xk ** 2) @ (sigma_beta ** 2) + sigma_bias ** 2)
    ref_train = ref_mean + ref_sig * epsilon
    assert bool(jnp.allclose(out_train, ref_train, rtol=5e-2, atol=5e-2)), \
        "train output mismatch vs reference"

    print("KERNEL_OK")
</pallas_src>

<mosaic_0001>
module attributes {stable_mosaic.version = 11 : i64} {
  func.func @_fwd_train_kernel(%arg0: i32, %arg1: i32, %arg2: i32, %arg3: memref<16x32xbf16, #tpu.memory_space<vmem>>, %arg4: memref<32x128xf32, #tpu.memory_space<vmem>>, %arg5: memref<32x128xf32, #tpu.memory_space<vmem>>, %arg6: memref<1x128xf32, #tpu.memory_space<vmem>>, %arg7: memref<1x128xf32, #tpu.memory_space<vmem>>, %arg8: memref<1x32xf32, #tpu.memory_space<vmem>>, %arg9: memref<1x32xf32, #tpu.memory_space<vmem>>, %arg10: memref<16x128xbf16, #tpu.memory_space<vmem>>, %arg11: memref<16x128xf32, #tpu.memory_space<vmem>>, %arg12: memref<1x1x8x128xf32, #tpu.memory_space<vmem>>, %arg13: memref<16x128xf32, #tpu.memory_space<vmem>>, %arg14: memref<16x128xf32, #tpu.memory_space<vmem>>, %arg15: memref<1xf32, #tpu.memory_space<smem>>) attributes {dimension_semantics = [#tpu.dimension_semantics<parallel>, #tpu.dimension_semantics<parallel>, #tpu.dimension_semantics<arbitrary>], iteration_bounds = array<i64: 1, 1, 1>, scalar_prefetch = 0 : i64, scratch_operands = 3 : i64, tpu.core_type = #tpu.core_type<tc>, window_params = [{transform_indices = @transform_0, window_bounds = array<i64: 16, 32>}, {transform_indices = @transform_1, window_bounds = array<i64: 32, 128>}, {transform_indices = @transform_2, window_bounds = array<i64: 32, 128>}, {transform_indices = @transform_3, window_bounds = array<i64: 1, 128>}, {transform_indices = @transform_4, window_bounds = array<i64: 1, 128>}, {transform_indices = @transform_5, window_bounds = array<i64: 1, 32>}, {transform_indices = @transform_6, window_bounds = array<i64: 1, 32>}, {transform_indices = @transform_7, window_bounds = array<i64: 16, 128>}, {transform_indices = @transform_8, window_bounds = array<i64: 16, 128>}, {transform_indices = @transform_9, window_bounds = array<i64: 1, 1, 8, 128>}]} {
    %c0_i32 = arith.constant 0 : i32
    %0 = arith.cmpi eq, %arg2, %c0_i32 : i32
    %1 = arith.extui %0 : i1 to i32
    %c0_i32_0 = arith.constant 0 : i32
    %2 = arith.cmpi ne, %1, %c0_i32_0 : i32
    scf.if %2 {
      %cst_43 = arith.constant 0.000000e+00 : f32
      %76 = vector.broadcast %cst_43 : f32 to vector<16x128xf32>
      %c0_44 = arith.constant 0 : index
      %c0_45 = arith.constant 0 : index
      %77 = vector.load %arg13[%c0_44, %c0_45] : memref<16x128xf32, #tpu.memory_space<vmem>>, vector<16x128xf32>
      tpu.vector_store %arg13[%c0_44, %c0_45], %76 {strides = array<i32>} : memref<16x128xf32, #tpu.memory_space<vmem>>, vector<16x128xf32>,
      %cst_46 = arith.constant 0.000000e+00 : f32
      %78 = vector.broadcast %cst_46 : f32 to vector<16x128xf32>
      %c0_47 = arith.constant 0 : index
      %c0_48 = arith.constant 0 : index
      %79 = vector.load %arg14[%c0_47, %c0_48] : memref<16x128xf32, #tpu.memory_space<vmem>>, vector<16x128xf32>
      tpu.vector_store %arg14[%c0_47, %c0_48], %78 {strides = array<i32>} : memref<16x128xf32, #tpu.memory_space<vmem>>, vector<16x128xf32>,
      %cst_49 = arith.constant 0.000000e+00 : f32
      %c0_50 = arith.constant 0 : index
      %80 = memref.load %arg15[%c0_50] : memref<1xf32, #tpu.memory_space<smem>>
      memref.store %cst_49, %arg15[%c0_50] : memref<1xf32, #tpu.memory_space<smem>>
    } else {
    }
    %c0 = arith.constant 0 : index
    %c0_1 = arith.constant 0 : index
    %3 = vector.load %arg4[%c0, %c0_1] : memref<32x128xf32, #tpu.memory_space<vmem>>, vector<32x128xf32>
    %c0_2 = arith.constant 0 : index
    %c0_3 = arith.constant 0 : index
    %4 = vector.load %arg5[%c0_2, %c0_3] : memref<32x128xf32, #tpu.memory_space<vmem>>, vector<32x128xf32>
    %cst = arith.constant 0.000000e+00 : f32
    %5 = vector.broadcast %cst : f32 to vector<32x128xf32>
    %6 = arith.maximumf %4, %5 : vector<32x128xf32>
    %7 = math.absf %4 : vector<32x128xf32>
    %cst_4 = arith.constant 0.000000e+00 : f32
    %8 = vector.broadcast %cst_4 : f32 to vector<32x128xf32>
    %9 = arith.subf %8, %7 : vector<32x128xf32>
    %10 = math.exp %9 : vector<32x128xf32>
    %cst_5 = arith.constant 1.000000e+00 : f32
    %11 = vector.broadcast %cst_5 : f32 to vector<32x128xf32>
    %12 = arith.addf %11, %10 : vector<32x128xf32>
    %13 = math.log %12 : vector<32x128xf32>
    %14 = arith.addf %6, %13 : vector<32x128xf32>
    %15 = arith.mulf %14, %14 : vector<32x128xf32>
    %c0_6 = arith.constant 0 : index
    %c0_7 = arith.constant 0 : index
    %16 = vector.load %arg9[%c0_6, %c0_7] : memref<1x32xf32, #tpu.memory_space<vmem>>, vector<1x32xf32>
    %c0_8 = arith.constant 0 : index
    %c0_9 = arith.constant 0 : index
    %17 = vector.load %arg8[%c0_8, %c0_9] : memref<1x32xf32, #tpu.memory_space<vmem>>, vector<1x32xf32>
    %cst_10 = arith.constant 1.000000e-07 : f32
    %18 = vector.broadcast %cst_10 : f32 to vector<1x32xf32>
    %19 = arith.addf %16, %18 : vector<1x32xf32>
    %20 = math.log %19 : vector<1x32xf32>
    %21 = arith.addf %17, %20 : vector<1x32xf32>
    %cst_11 = arith.constant 1.000000e+00 : f32
    %22 = vector.broadcast %cst_11 : f32 to vector<1x32xf32>
    %23 = arith.subf %22, %16 : vector<1x32xf32>
    %cst_12 = arith.constant 1.000000e-07 : f32
    %24 = vector.broadcast %cst_12 : f32 to vector<1x32xf32>
    %25 = arith.addf %23, %24 : vector<1x32xf32>
    %26 = math.log %25 : vector<1x32xf32>
    %27 = arith.subf %21, %26 : vector<1x32xf32>
    %cst_13 = arith.constant 1.000000e-01 : f32
    %28 = vector.broadcast %cst_13 : f32 to vector<1x32xf32>
    %29 = arith.divf %27, %28 : vector<1x32xf32>
    %cst_14 = arith.constant 0.000000e+00 : f32
    %30 = vector.broadcast %cst_14 : f32 to vector<1x32xf32>
    %31 = arith.subf %30, %29 : vector<1x32xf32>
    %32 = math.exp %31 : vector<1x32xf32>
    %cst_15 = arith.constant 1.000000e+00 : f32
    %33 = vector.broadcast %cst_15 : f32 to vector<1x32xf32>
    %34 = arith.addf %33, %32 : vector<1x32xf32>
    %cst_16 = arith.constant 1.000000e+00 : f32
    %35 = vector.broadcast %cst_16 : f32 to vector<1x32xf32>
    %36 = arith.divf %35, %34 : vector<1x32xf32>
    %cst_17 = arith.constant 1.200000e+00 : f32
    %37 = vector.broadcast %cst_17 : f32 to vector<1x32xf32>
    %38 = arith.mulf %36, %37 : vector<1x32xf32>
    %cst_18 = arith.constant -1.000000e-01 : f32
    %39 = vector.broadcast %cst_18 : f32 to vector<1x32xf32>
    %40 = arith.addf %38, %39 : vector<1x32xf32>
    %cst_19 = arith.constant 0.000000e+00 : f32
    %cst_20 = arith.constant 1.000000e+00 : f32
    %41 = vector.broadcast %cst_19 : f32 to vector<1x32xf32>
    %42 = arith.maximumf %41, %40 : vector<1x32xf32>
    %43 = vector.broadcast %cst_20 : f32 to vector<1x32xf32>
    %44 = arith.minimumf %43, %42 : vector<1x32xf32>
    %c0_21 = arith.constant 0 : index
    %c0_22 = arith.constant 0 : index
    %45 = vector.load %arg3[%c0_21, %c0_22] : memref<16x32xbf16, #tpu.memory_space<vmem>>, vector<16x32xbf16>
    %46 = arith.truncf %44 : vector<1x32xf32> to vector<1x32xbf16>
    %47 = vector.broadcast %46 : vector<1x32xbf16> to vector<16x32xbf16>
    %48 = arith.mulf %45, %47 : vector<16x32xbf16>
    %c0_23 = arith.constant 0 : index
    %c0_24 = arith.constant 0 : index
    %49 = vector.load %arg13[%c0_23, %c0_24] : memref<16x128xf32, #tpu.memory_space<vmem>>, vector<16x128xf32>
    %50 = arith.truncf %3 : vector<32x128xf32> to vector<32x128xbf16>
    %cst_25 = arith.constant dense<0.000000e+00> : vector<16x128xf32>
    %51 = tpu.matmul %48, %50, %cst_25 {dimension_numbers = #tpu.dot_dimension_numbers<[1], [0], [0], [1], [0, 0, 1, 1], [], []>} : vector<16x32xbf16>, vector<32x128xbf16>, vector<16x128xf32> -> vector<16x128xf32>
    %52 = arith.addf %49, %51 : vector<16x128xf32>
    %c0_26 = arith.constant 0 : index
    %c0_27 = arith.constant 0 : index
    %53 = vector.load %arg13[%c0_26, %c0_27] : memref<16x128xf32, #tpu.memory_space<vmem>>, vector<16x128xf32>
    tpu.vector_store %arg13[%c0_26, %c0_27], %52 {strides = array<i32>} : memref<16x128xf32, #tpu.memory_space<vmem>>, vector<16x128xf32>,
    %c0_28 = arith.constant 0 : index
    %c0_29 = arith.constant 0 : index
    %54 = vector.load %arg14[%c0_28, %c0_29] : memref<16x128xf32, #tpu.memory_space<vmem>>, vector<16x128xf32>
    %55 = arith.mulf %48, %48 : vector<16x32xbf16>
    %56 = arith.truncf %15 : vector<32x128xf32> to vector<32x128xbf16>
    %cst_30 = arith.constant dense<0.000000e+00> : vector<16x128xf32>
    %57 = tpu.matmul %55, %56, %cst_30 {dimension_numbers = #tpu.dot_dimension_numbers<[1], [0], [0], [1], [0, 0, 1, 1], [], []>} : vector<16x32xbf16>, vector<32x128xbf16>, vector<16x128xf32> -> vector<16x128xf32>
    %58 = arith.addf %54, %57 : vector<16x128xf32>
    %c0_31 = arith.constant 0 : index
    %c0_32 = arith.constant 0 : index
    %59 = vector.load %arg14[%c0_31, %c0_32] : memref<16x128xf32, #tpu.memory_space<vmem>>, vector<16x128xf32>
    tpu.vector_store %arg14[%c0_31, %c0_32], %58 {strides = array<i32>} : memref<16x128xf32, #tpu.memory_space<vmem>>, vector<16x128xf32>,
    %c0_i32_33 = arith.constant 0 : i32
    %60 = arith.cmpi eq, %arg0, %c0_i32_33 : i32
    %61 = arith.extui %60 : i1 to i32
    %c0_i32_34 = arith.constant 0 : i32
    %62 = arith.cmpi ne, %61, %c0_i32_34 : i32
    scf.if %62 {
      %76 = tpu.iota {dimensions = array<i32: 0>} : vector<32x128xi32>
      %c32_i32 = arith.constant 32 : i32
      %77 = arith.muli %arg2, %c32_i32 : i32
      %78 = vector.broadcast %77 : i32 to vector<32x128xi32>
      %79 = arith.addi %76, %78 : vector<32x128xi32>
      %80 = tpu.iota {dimensions = array<i32: 1>} : vector<32x128xi32>
      %c128_i32 = arith.constant 128 : i32
      %81 = arith.muli %arg1, %c128_i32 : i32
      %82 = vector.broadcast %81 : i32 to vector<32x128xi32>
      %83 = arith.addi %80, %82 : vector<32x128xi32>
      %c32_i32_43 = arith.constant 32 : i32
      %84 = vector.broadcast %c32_i32_43 : i32 to vector<32x128xi32>
      %85 = arith.cmpi slt, %79, %84 : vector<32x128xi32>
      %c32_i32_44 = arith.constant 32 : i32
      %86 = vector.broadcast %c32_i32_44 : i32 to vector<32x128xi32>
      %87 = arith.cmpi slt, %83, %86 : vector<32x128xi32>
      %88 = arith.andi %85, %87 : vector<32x128xi1>
      %c0_45 = arith.constant 0 : index
      %89 = memref.load %arg15[%c0_45] : memref<1xf32, #tpu.memory_space<smem>>
      %90 = arith.mulf %3, %3 : vector<32x128xf32>
      %91 = arith.addf %15, %90 : vector<32x128xf32>
      %cst_46 = arith.constant 1.38888884 : f32
      %92 = vector.broadcast %cst_46 : f32 to vector<32x128xf32>
      %93 = arith.mulf %91, %92 : vector<32x128xf32>
      %cst_47 = arith.constant 1.000000e-07 : f32
      %94 = vector.broadcast %cst_47 : f32 to vector<32x128xf32>
      %95 = arith.addf %14, %94 : vector<32x128xf32>
      %96 = math.log %95 : vector<32x128xf32>
      %97 = arith.subf %93, %96 : vector<32x128xf32>
      %cst_48 = arith.constant -0.510825634 : f32
      %98 = vector.broadcast %cst_48 : f32 to vector<32x128xf32>
      %99 = arith.addf %97, %98 : vector<32x128xf32>
      %cst_49 = arith.constant 5.000000e-01 : f32
      %100 = vector.broadcast %cst_49 : f32 to vector<32x128xf32>
      %101 = arith.subf %99, %100 : vector<32x128xf32>
      %cst_50 = arith.constant 0.000000e+00 : f32
      %102 = vector.broadcast %cst_50 : f32 to vector<32x128xf32>
      %103 = arith.select %88, %101, %102 : vector<32x128xi1>, vector<32x128xf32>
      %104 = vector.shape_cast %103 : vector<32x128xf32> to vector<1x32x128xf32>
      %cst_51 = arith.constant dense<0.000000e+00> : vector<1xf32>
      %105 = vector.multi_reduction <add>, %104, %cst_51 [1, 2] : vector<1x32x128xf32> to vector<1xf32>
      %106 = vector.shape_cast %105 : vector<1xf32> to vector<1x1x1xf32>
      %107 = vector.extract %106[0, 0, 0] : f32 from vector<1x1x1xf32>
      %108 = arith.addf %89, %107 : f32
      %c0_52 = arith.constant 0 : index
      %109 = memref.load %arg15[%c0_52] : memref<1xf32, #tpu.memory_space<smem>>
      memref.store %108, %arg15[%c0_52] : memref<1xf32, #tpu.memory_space<smem>>
    } else {
    }
    %c0_i32_35 = arith.constant 0 : i32
    %63 = arith.cmpi eq, %arg0, %c0_i32_35 : i32
    %c0_i32_36 = arith.constant 0 : i32
    %64 = arith.cmpi eq, %arg2, %c0_i32_36 : i32
    %65 = arith.andi %63, %64 : i1
    %66 = arith.extui %65 : i1 to i32
    %c0_i32_37 = arith.constant 0 : i32
    %67 = arith.cmpi ne, %66, %c0_i32_37 : i32
    scf.if %67 {
      %c0_43 = arith.constant 0 : index
      %c0_44 = arith.constant 0 : index
      %76 = vector.load %arg6[%c0_43, %c0_44] : memref<1x128xf32, #tpu.memory_space<vmem>>, vector<1x128xf32>
      %c0_45 = arith.constant 0 : index
      %c0_46 = arith.constant 0 : index
      %77 = vector.load %arg7[%c0_45, %c0_46] : memref<1x128xf32, #tpu.memory_space<vmem>>, vector<1x128xf32>
      %cst_47 = arith.constant 0.000000e+00 : f32
      %78 = vector.broadcast %cst_47 : f32 to vector<1x128xf32>
      %79 = arith.maximumf %77, %78 : vector<1x128xf32>
      %80 = math.absf %77 : vector<1x128xf32>
      %cst_48 = arith.constant 0.000000e+00 : f32
      %81 = vector.broadcast %cst_48 : f32 to vector<1x128xf32>
      %82 = arith.subf %81, %80 : vector<1x128xf32>
      %83 = math.exp %82 : vector<1x128xf32>
      %cst_49 = arith.constant 1.000000e+00 : f32
      %84 = vector.broadcast %cst_49 : f32 to vector<1x128xf32>
      %85 = arith.addf %84, %83 : vector<1x128xf32>
      %86 = math.log %85 : vector<1x128xf32>
      %87 = arith.addf %79, %86 : vector<1x128xf32>
      %88 = tpu.iota {dimensions = array<i32: 1>} : vector<1x128xi32>
      %c128_i32 = arith.constant 128 : i32
      %89 = arith.muli %arg1, %c128_i32 : i32
      %90 = vector.broadcast %89 : i32 to vector<1x128xi32>
      %91 = arith.addi %88, %90 : vector<1x128xi32>
      %c0_50 = arith.constant 0 : index
      %92 = memref.load %arg15[%c0_50] : memref<1xf32, #tpu.memory_space<smem>>
      %c32_i32 = arith.constant 32 : i32
      %93 = vector.broadcast %c32_i32 : i32 to vector<1x128xi32>
      %94 = arith.cmpi slt, %91, %93 : vector<1x128xi32>
      %95 = arith.mulf %87, %87 : vector<1x128xf32>
      %96 = arith.mulf %76, %76 : vector<1x128xf32>
      %97 = arith.addf %95, %96 : vector<1x128xf32>
      %cst_51 = arith.constant 1.38888884 : f32
      %98 = vector.broadcast %cst_51 : f32 to vector<1x128xf32>
      %99 = arith.mulf %97, %98 : vector<1x128xf32>
      %cst_52 = arith.constant 1.000000e-07 : f32
      %100 = vector.broadcast %cst_52 : f32 to vector<1x128xf32>
      %101 = arith.addf %87, %100 : vector<1x128xf32>
      %102 = math.log %101 : vector<1x128xf32>
      %103 = arith.subf %99, %102 : vector<1x128xf32>
      %cst_53 = arith.constant -0.510825634 : f32
      %104 = vector.broadcast %cst_53 : f32 to vector<1x128xf32>
      %105 = arith.addf %103, %104 : vector<1x128xf32>
      %cst_54 = arith.constant 5.000000e-01 : f32
      %106 = vector.broadcast %cst_54 : f32 to vector<1x128xf32>
      %107 = arith.subf %105, %106 : vector<1x128xf32>
      %cst_55 = arith.constant 0.000000e+00 : f32
      %108 = vector.broadcast %cst_55 : f32 to vector<1x128xf32>
      %109 = arith.select %94, %107, %108 : vector<1x128xi1>, vector<1x128xf32>
      %110 = vector.shape_cast %109 : vector<1x128xf32> to vector<1x1x128xf32>
      %cst_56 = arith.constant dense<0.000000e+00> : vector<1xf32>
      %111 = vector.multi_reduction <add>, %110, %cst_56 [1, 2] : vector<1x1x128xf32> to vector<1xf32>
      %112 = vector.shape_cast %111 : vector<1xf32> to vector<1x1x1xf32>
      %113 = vector.extract %112[0, 0, 0] : f32 from vector<1x1x1xf32>
      %114 = arith.addf %92, %113 : f32
      %c0_57 = arith.constant 0 : index
      %115 = memref.load %arg15[%c0_57] : memref<1xf32, #tpu.memory_space<smem>>
      memref.store %114, %arg15[%c0_57] : memref<1xf32, #tpu.memory_space<smem>>
    } else {
    }
    %c0_i32_38 = arith.constant 0 : i32
    %68 = arith.cmpi eq, %arg0, %c0_i32_38 : i32
    %c0_i32_39 = arith.constant 0 : i32
    %69 = arith.cmpi eq, %arg1, %c0_i32_39 : i32
    %70 = arith.andi %68, %69 : i1
    %71 = arith.extui %70 : i1 to i32
    %c0_i32_40 = arith.constant 0 : i32
    %72 = arith.cmpi ne, %71, %c0_i32_40 : i32
    scf.if %72 {
      %c0_43 = arith.constant 0 : index
      %c0_44 = arith.constant 0 : index
      %76 = vector.load %arg8[%c0_43, %c0_44] : memref<1x32xf32, #tpu.memory_space<vmem>>, vector<1x32xf32>
      %cst_45 = arith.constant 0.000000e+00 : f32
      %77 = vector.broadcast %cst_45 : f32 to vector<1x32xf32>
      %78 = arith.subf %77, %76 : vector<1x32xf32>
      %79 = math.exp %78 : vector<1x32xf32>
      %cst_46 = arith.constant 1.000000e+00 : f32
      %80 = vector.broadcast %cst_46 : f32 to vector<1x32xf32>
      %81 = arith.addf %80, %79 : vector<1x32xf32>
      %cst_47 = arith.constant 1.000000e+00 : f32
      %82 = vector.broadcast %cst_47 : f32 to vector<1x32xf32>
      %83 = arith.divf %82, %81 : vector<1x32xf32>
      %84 = tpu.iota {dimensions = array<i32: 1>} : vector<1x32xi32>
      %c32_i32 = arith.constant 32 : i32
      %85 = arith.muli %arg2, %c32_i32 : i32
      %86 = vector.broadcast %85 : i32 to vector<1x32xi32>
      %87 = arith.addi %84, %86 : vector<1x32xi32>
      %cst_48 = arith.constant 1.000000e-07 : f32
      %88 = vector.broadcast %cst_48 : f32 to vector<1x32xf32>
      %89 = arith.addf %83, %88 : vector<1x32xf32>
      %90 = math.log %89 : vector<1x32xf32>
      %91 = arith.mulf %83, %90 : vector<1x32xf32>
      %cst_49 = arith.constant 1.000000e+00 : f32
      %92 = vector.broadcast %cst_49 : f32 to vector<1x32xf32>
      %93 = arith.subf %92, %83 : vector<1x32xf32>
      %cst_50 = arith.constant 1.000000e+00 : f32
      %94 = vector.broadcast %cst_50 : f32 to vector<1x32xf32>
      %95 = arith.subf %94, %83 : vector<1x32xf32>
      %cst_51 = arith.constant 1.000000e-07 : f32
      %96 = vector.broadcast %cst_51 : f32 to vector<1x32xf32>
      %97 = arith.addf %95, %96 : vector<1x32xf32>
      %98 = math.log %97 : vector<1x32xf32>
      %99 = arith.mulf %93, %98 : vector<1x32xf32>
      %100 = arith.addf %91, %99 : vector<1x32xf32>
      %cst_52 = arith.constant -2.30258417 : f32
      %101 = vector.broadcast %cst_52 : f32 to vector<1x32xf32>
      %102 = arith.mulf %83, %101 : vector<1x32xf32>
      %cst_53 = arith.constant 1.000000e+00 : f32
      %103 = vector.broadcast %cst_53 : f32 to vector<1x32xf32>
      %104 = arith.subf %103, %83 : vector<1x32xf32>
      %cst_54 = arith.constant -0.105360404 : f32
      %105 = vector.broadcast %cst_54 : f32 to vector<1x32xf32>
      %106 = arith.mulf %104, %105 : vector<1x32xf32>
      %107 = arith.addf %102, %106 : vector<1x32xf32>
      %108 = arith.subf %100, %107 : vector<1x32xf32>
      %c0_55 = arith.constant 0 : index
      %109 = memref.load %arg15[%c0_55] : memref<1xf32, #tpu.memory_space<smem>>
      %c32_i32_56 = arith.constant 32 : i32
      %110 = vector.broadcast %c32_i32_56 : i32 to vector<1x32xi32>
      %111 = arith.cmpi slt, %87, %110 : vector<1x32xi32>
      %cst_57 = arith.constant 0.000000e+00 : f32
      %112 = vector.broadcast %cst_57 : f32 to vector<1x32xf32>
      %113 = arith.select %111, %108, %112 : vector<1x32xi1>, vector<1x32xf32>
      %114 = vector.shape_cast %113 : vector<1x32xf32> to vector<1x1x32xf32>
      %cst_58 = arith.constant dense<0.000000e+00> : vector<1xf32>
      %115 = vector.multi_reduction <add>, %114, %cst_58 [1, 2] : vector<1x1x32xf32> to vector<1xf32>
      %116 = vector.shape_cast %115 : vector<1xf32> to vector<1x1x1xf32>
      %117 = vector.extract %116[0, 0, 0] : f32 from vector<1x1x1xf32>
      %118 = arith.addf %109, %117 : f32
      %c0_59 = arith.constant 0 : index
      %119 = memref.load %arg15[%c0_59] : memref<1xf32, #tpu.memory_space<smem>>
      memref.store %118, %arg15[%c0_59] : memref<1xf32, #tpu.memory_space<smem>>
    } else {
    }
    %c0_i32_41 = arith.constant 0 : i32
    %73 = arith.cmpi eq, %arg2, %c0_i32_41 : i32
    %74 = arith.extui %73 : i1 to i32
    %c0_i32_42 = arith.constant 0 : i32
    %75 = arith.cmpi ne, %74, %c0_i32_42 : i32
    scf.if %75 {
      %c0_43 = arith.constant 0 : index
      %c0_44 = arith.constant 0 : index
      %76 = vector.load %arg7[%c0_43, %c0_44] : memref<1x128xf32, #tpu.memory_space<vmem>>, vector<1x128xf32>
      %cst_45 = arith.constant 0.000000e+00 : f32
      %77 = vector.broadcast %cst_45 : f32 to vector<1x128xf32>
      %78 = arith.maximumf %76, %77 : vector<1x128xf32>
      %79 = math.absf %76 : vector<1x128xf32>
      %cst_46 = arith.constant 0.000000e+00 : f32
      %80 = vector.broadcast %cst_46 : f32 to vector<1x128xf32>
      %81 = arith.subf %80, %79 : vector<1x128xf32>
      %82 = math.exp %81 : vector<1x128xf32>
      %cst_47 = arith.constant 1.000000e+00 : f32
      %83 = vector.broadcast %cst_47 : f32 to vector<1x128xf32>
      %84 = arith.addf %83, %82 : vector<1x128xf32>
      %85 = math.log %84 : vector<1x128xf32>
      %86 = arith.addf %78, %85 : vector<1x128xf32>
      %c0_48 = arith.constant 0 : index
      %c0_49 = arith.constant 0 : index
      %87 = vector.load %arg13[%c0_48, %c0_49] : memref<16x128xf32, #tpu.memory_space<vmem>>, vector<16x128xf32>
      %c0_50 = arith.constant 0 : index
      %c0_51 = arith.constant 0 : index
      %88 = vector.load %arg6[%c0_50, %c0_51] : memref<1x128xf32, #tpu.memory_space<vmem>>, vector<1x128xf32>
      %89 = vector.broadcast %88 : vector<1x128xf32> to vector<16x128xf32>
      %90 = arith.addf %87, %89 : vector<16x128xf32>
      %c0_52 = arith.constant 0 : index
      %c0_53 = arith.constant 0 : index
      %91 = vector.load %arg14[%c0_52, %c0_53] : memref<16x128xf32, #tpu.memory_space<vmem>>, vector<16x128xf32>
      %92 = arith.mulf %86, %86 : vector<1x128xf32>
      %93 = vector.broadcast %92 : vector<1x128xf32> to vector<16x128xf32>
      %94 = arith.addf %91, %93 : vector<16x128xf32>
      %95 = math.sqrt %94 : vector<16x128xf32>
      %c0_54 = arith.constant 0 : index
      %c0_55 = arith.constant 0 : index
      %96 = vector.load %arg10[%c0_54, %c0_55] : memref<16x128xbf16, #tpu.memory_space<vmem>>, vector<16x128xbf16>
      %97 = arith.extf %96 : vector<16x128xbf16> to vector<16x128xf32>
      %98 = arith.mulf %95, %97 : vector<16x128xf32>
      %99 = arith.addf %90, %98 : vector<16x128xf32>
      %c0_56 = arith.constant 0 : index
      %c0_57 = arith.constant 0 : index
      %100 = vector.load %arg11[%c0_56, %c0_57] : memref<16x128xf32, #tpu.memory_space<vmem>>, vector<16x128xf32>
      tpu.vector_store %arg11[%c0_56, %c0_57], %99 {strides = array<i32>} : memref<16x128xf32, #tpu.memory_space<vmem>>, vector<16x128xf32>,
      %c0_i32_58 = arith.constant 0 : i32
      %101 = arith.cmpi eq, %arg0, %c0_i32_58 : i32
      %c0_59 = arith.constant 0 : index
      %102 = memref.load %arg15[%c0_59] : memref<1xf32, #tpu.memory_space<smem>>
      %cst_60 = arith.constant 0.000000e+00 : f32
      %103 = arith.select %101, %102, %cst_60 : f32
      %cst_61 = arith.constant 0.000000e+00 : f32
      %104 = vector.broadcast %cst_61 : f32 to vector<1x1x8x128xf32>
      %cst_62 = arith.constant 9.765625E-4 : f32
      %105 = arith.mulf %103, %cst_62 : f32
      %106 = vector.broadcast %105 : f32 to vector<1x1x8x128xf32>
      %107 = arith.addf %104, %106 : vector<1x1x8x128xf32>
      %c0_63 = arith.constant 0 : index
      %c0_64 = arith.constant 0 : index
      %c0_65 = arith.constant 0 : index
      %c0_66 = arith.constant 0 : index
      %108 = vector.load %arg12[%c0_63, %c0_64, %c0_65, %c0_66] : memref<1x1x8x128xf32, #tpu.memory_space<vmem>>, vector<1x1x8x128xf32>
      tpu.vector_store %arg12[%c0_63, %c0_64, %c0_65, %c0_66], %107 {strides = array<i32>} : memref<1x1x8x128xf32, #tpu.memory_space<vmem>>, vector<1x1x8x128xf32>,
    } else {
    }
    return
  }
  func.func @transform_0(%arg0: i32, %arg1: i32, %arg2: i32) -> (i32, i32) {
    %c0_i32 = arith.constant 0 : i32
    return %arg0, %arg2 : i32, i32
  }
  func.func @transform_1(%arg0: i32, %arg1: i32, %arg2: i32) -> (i32, i32) {
    %c0_i32 = arith.constant 0 : i32
    return %arg2, %arg1 : i32, i32
  }
  func.func @transform_2(%arg0: i32, %arg1: i32, %arg2: i32) -> (i32, i32) {
    %c0_i32 = arith.constant 0 : i32
    return %arg2, %arg1 : i32, i32
  }
  func.func @transform_3(%arg0: i32, %arg1: i32, %arg2: i32) -> (i32, i32) {
    %c0_i32 = arith.constant 0 : i32
    %c0_i32_0 = arith.constant 0 : i32
    return %c0_i32, %arg1 : i32, i32
  }
  func.func @transform_4(%arg0: i32, %arg1: i32, %arg2: i32) -> (i32, i32) {
    %c0_i32 = arith.constant 0 : i32
    %c0_i32_0 = arith.constant 0 : i32
    return %c0_i32, %arg1 : i32, i32
  }
  func.func @transform_5(%arg0: i32, %arg1: i32, %arg2: i32) -> (i32, i32) {
    %c0_i32 = arith.constant 0 : i32
    %c0_i32_0 = arith.constant 0 : i32
    return %c0_i32, %arg2 : i32, i32
  }
  func.func @transform_6(%arg0: i32, %arg1: i32, %arg2: i32) -> (i32, i32) {
    %c0_i32 = arith.constant 0 : i32
    %c0_i32_0 = arith.constant 0 : i32
    return %c0_i32, %arg2 : i32, i32
  }
  func.func @transform_7(%arg0: i32, %arg1: i32, %arg2: i32) -> (i32, i32) {
    %c0_i32 = arith.constant 0 : i32
    return %arg0, %arg1 : i32, i32
  }
  func.func @transform_8(%arg0: i32, %arg1: i32, %arg2: i32) -> (i32, i32) {
    %c0_i32 = arith.constant 0 : i32
    return %arg0, %arg1 : i32, i32
  }
  func.func @transform_9(%arg0: i32, %arg1: i32, %arg2: i32) -> (i32, i32, i32, i32) {
    %c0_i32 = arith.constant 0 : i32
    %c0_i32_0 = arith.constant 0 : i32
    %c0_i32_1 = arith.constant 0 : i32
    return %arg0, %arg1, %c0_i32, %c0_i32_0 : i32, i32, i32, i32
  }
}

</mosaic_0001>

<bundles_post_ra>
// kernel: tpu_custom_call.1
= control target key start
LH: loop header
LB: loop body
LE: loop exit
PB: predicated region body
PF: predicated region fallthrough
CT: control target
= control target key end

     0   :  { %15 = vsyncpa [#allocation6], 0  ;;  %s1025_s0 = inlined_call_operand.hbm [shape: bf16[16,32], index: 0, kind: input, shape index: {}]   ;;  %s1026_s1 = inlined_call_operand.hbm [shape: f32[32,128], index: 1, kind: input, shape index: {}]   ;;  %s1027_s2 = inlined_call_operand.hbm [shape: f32[32,128], index: 2, kind: input, shape index: {}]   ;;  %s1028_s3 = inlined_call_operand.vmem [shape: f32[1,128], index: 3, kind: input, shape index: {}]   ;;  %s1029_s4 = inlined_call_operand.vmem [shape: f32[1,128], index: 4, kind: input, shape index: {}]   ;;  %s1030_s5 = inlined_call_operand.vmem [shape: f32[1,32], index: 5, kind: input, shape index: {}]   ;;  %s1031_s6 = inlined_call_operand.vmem [shape: f32[1,32], index: 6, kind: input, shape index: {}]   ;;  %s1032_s7 = inlined_call_operand.vmem [shape: bf16[16,128], index: 7, kind: input, shape index: {}]   ;;  %s1033_s8 = inlined_call_operand.hbm [shape: f32[16,128], index: 8, kind: output, shape index: {0}]   ;;  %s1034_s9 = inlined_call_operand.hbm [shape: f32[1,1,8,128], index: 9, kind: output, shape index: {1}]  }
   0x1   :  { %16 = vsyncpa [#allocation9], 0 }
   0x2   :  { %17 = vsyncpa [#allocation7], 0 }
   0x3   :  { %18 = vsyncpa [#allocation13], 0  ;;  %s792_s30 = smov [#allocation8]   ;;  %s674_s13 = scalar_lea.hbm %s1026_s1, 512 }
   0x4   :  { %s36_s10 = sshll.u32 %s792_s30, 4  ;;  %p675_p0 = scmp.ne.s32.totalorder %s1026_s1, %s674_s13  ;;  %s37_s10 = int_to_ptr.vmem [resolvable:$true] %s36_s10 }
   0x5   :  { %p678_p1 = scmp.lt.u32.totalorder %s674_s13, %s1026_s1 }
   0x7   :  { %p680_p2 = pnand %p678_p1, %p675_p0 }
   0x9   :  { %683 = shalt.err (!%p680_p2)
}
   0xa   :  { %s684_s18 = scalar_lea.vmem %s37_s10, 512  ;;  %p689_p4 = scmp.lt.s32.totalorder %s37_s10, %s37_s10 }
   0xb   :  { %p685_p3 = scmp.ne.s32.totalorder %s37_s10, %s684_s18  ;;  %p690_p5 = scmp.lt.s32.totalorder %s684_s18, %s684_s18 }
   0xd   :  { %p691_p6 = por %p690_p5, %p689_p4 }
   0xf   :  { %p692_p7 = pnand %p691_p6, %p685_p3 }
  0x11   :  { %695 = shalt.err (!%p692_p7)
}
  0x12   :  { %s793_s19 = smov 128   ;;  %s794_s20 = smov 8  }
  0x13   :  { %42 = dma.hbm_to_vmem [thread:$0]  %s1026_s1, 512, %s37_s10, [#allocation9], %s793_s19, %s793_s19, %s794_s20  }
  0x14   :  { %s795_s23 = smov [#allocation5]   ;;  %s696_s27 = scalar_lea.hbm %s1025_s0, 128 }
  0x15   :  { %s24_s24 = sshll.u32 %s795_s23, 4  ;;  %p697_p8 = scmp.ne.s32.totalorder %s1025_s0, %s696_s27  ;;  %s25_s24 = int_to_ptr.vmem [resolvable:$true] %s24_s24 }
  0x16   :  { %p700_p9 = scmp.lt.u32.totalorder %s696_s27, %s1025_s0 }
  0x18   :  { %p702_p10 = pnand %p700_p9, %p697_p8 }
  0x1a   :  { %705 = shalt.err (!%p702_p10)
}
  0x1b   :  { %s706_s12 = scalar_lea.vmem %s25_s24, 128  ;;  %p711_p12 = scmp.lt.s32.totalorder %s25_s24, %s25_s24 }
  0x1c   :  { %p707_p11 = scmp.ne.s32.totalorder %s25_s24, %s706_s12  ;;  %p712_p13 = scmp.lt.s32.totalorder %s706_s12, %s706_s12 }
  0x1e   :  { %p713_p0 = por %p712_p13, %p711_p12 }
  0x20   :  { %p714_p1 = pnand %p713_p0, %p707_p11 }
  0x22   :  { %717 = shalt.err (!%p714_p1)
}
  0x23   :  { %s796_s1 = smov 64   ;;  %s797_s10 = smov 4  }
  0x24   :  { %30 = dma.hbm_to_vmem [thread:$0]  %s1025_s0, 128, %s25_s24, [#allocation6], %s796_s1, %s796_s1, %s797_s10  }
  0x25   :  { %s798_s15 = smov [#allocation10]   ;;  %s718_s21 = scalar_lea.hbm %s1027_s2, 512 }
  0x26   :  { %s48_s16 = sshll.u32 %s798_s15, 4  ;;  %p719_p2 = scmp.ne.s32.totalorder %s1027_s2, %s718_s21  ;;  %s49_s16 = int_to_ptr.vmem [resolvable:$true] %s48_s16 }
  0x27   :  { %p722_p3 = scmp.lt.u32.totalorder %s718_s21, %s1027_s2 }
  0x29   :  { %p724_p4 = pnand %p722_p3, %p719_p2 }
  0x2b   :  { %727 = shalt.err (!%p724_p4)
}
  0x2c   :  { %s728_s27 = scalar_lea.vmem %s49_s16, 512  ;;  %p733_p6 = scmp.lt.s32.totalorder %s49_s16, %s49_s16 }
  0x2d   :  { %p729_p5 = scmp.ne.s32.totalorder %s49_s16, %s728_s27  ;;  %p734_p7 = scmp.lt.s32.totalorder %s728_s27, %s728_s27 }
  0x2f   :  { %p735_p8 = por %p734_p7, %p733_p6 }
  0x31   :  { %p736_p9 = pnand %p735_p8, %p729_p5 }
  0x33   :  { %739 = shalt.err (!%p736_p9)
}
  0x34   :  { %54 = dma.hbm_to_vmem [thread:$0]  %s1027_s2, 512, %s49_s16, [#allocation9], %s793_s19, %s793_s19, %s794_s20  }
  0x35   :  { %784 = dma.done.wait [#allocation6], 128  }
  0x36   :  { %785 = vsyncadd [#allocation6], 4294967168 }
  0x37   :  { %786 = dma.done.wait [#allocation9], 1024  }
  0x38   :  { %787 = vsyncadd [#allocation9], 4294966272  ;;  %v799_v0 = vmov 0.0   ;;  %vm800_vm0 = vmmov 0   ;;  %v899_v1 = vld [vmem:[#allocation10] sm:$0xff]  ;;  %v901_v2 = vld [vmem:[#allocation10 + $0x8] sm:$0xff] }
  0x39   :  { %595 = vmatprep.subr.bf16.mxu1 %v799_v0  ;;  %599 = vmatprep.mubr.msk.bf16.mxu1 %vm800_vm0, %v799_v0  ;;  %v97_v3 = vand.u32 2147483647, %v899_v1  ;;  %v98_v4 = vand.u32 2147483647, %v901_v2  ;;  %v905_v5 = vld [vmem:[#allocation10 + $0x10] sm:$0xff]  ;;  %v907_v6 = vld [vmem:[#allocation10 + $0x18] sm:$0xff] }
  0x3a   :  { %587 = vmatprep.subr.bf16.mxu0 %v799_v0  ;;  %591 = vmatprep.mubr.msk.bf16.mxu0 %vm800_vm0, %v799_v0  ;;  %v133_v7 = vld [vmem:[%s1031_s6] sm:$0x1]  ;;  %v99_v10 = vand.u32 2147483647, %v905_v5  ;;  %v100_v11 = vand.u32 2147483647, %v907_v6 }
  0x3b   :  { %v101_v8 = vsub.f32 0.0, %v97_v3  ;;  %v102_v9 = vsub.f32 0.0, %v98_v4  ;;  %v135_v12 = vadd.f32 1e-07, %v133_v7  ;;  %v139_v15 = vsub.f32 1.0, %v133_v7  ;;  %v914_v19 = vld [vmem:[#allocation8] sm:$0xff] }
  0x3c   :  { %v103_v16 = vsub.f32 0.0, %v99_v10  ;;  %v104_v17 = vsub.f32 0.0, %v100_v11  ;;  %v916_v20 = vld [vmem:[#allocation8 + $0x8] sm:$0xff]  ;;  %v923_v24 = vld [vmem:[%s1029_s4] sm:$0x1]  ;;  %v925_v25 = vld [vmem:[#allocation8 + $0x10] sm:$0xff] }
  0x3d   :  { %v105_v13 = vmul.f32 1.442695, %v101_v8  ;;  %v107_v14 = vmul.f32 1.442695, %v102_v9  ;;  %620 = vlog2.f32 %v135_v12  ;;  %v140_v18 = vadd.f32 1e-07, %v139_v15 }
  0x3e   :  { %v109_v21 = vmul.f32 1.442695, %v103_v16  ;;  %v111_v22 = vmul.f32 1.442695, %v104_v17  ;;  %v174_v23 = vpack.c.bf16 %v916_v20, %v914_v19  ;;  %v927_v26 = vld [vmem:[#allocation8 + $0x18] sm:$0xff]  ;;  %v93_v56 = vmax.f32 %v899_v1, 0.0 }
  0x3f   :  { %622 = vpow2.f32 %v105_v13  ;;  %v426_v27 = vld [vmem:[%s1030_s5] sm:$0x1]  ;;  %v175_v28 = vpack.c.bf16 %v927_v26, %v925_v25  ;;  %v381_v29 = vand.u32 2147483647, %v923_v24  ;;  %v94_v58 = vmax.f32 %v901_v2, 0.0  ;;  %s801_s22 = smov [#allocation12]  }
  0x40   :  { %624 = vpow2.f32 %v107_v14  ;;  %588 = vmatpush3.bf16.msra.mxu0 %v174_v23  ;;  %v427_v30 = vsub.f32 0.0, %v426_v27  ;;  %v134_v35 = vld [vmem:[%s1030_s5] sm:$0x1]  ;;  %v95_v62 = vmax.f32 %v905_v5, 0.0  ;;  %v96_v4 = vmax.f32 %v907_v6, 0.0  ;;  %s552_s23 = sshll.u32 %s801_s22, 4  ;;  %s553_s23 = int_to_ptr.vmem [resolvable:$true] %s552_s23 }
  0x41   :  { %626 = vlog2.f32 %v140_v18  ;;  %589 = vmatprep.subr.bf16.mxu0 %v799_v0  ;;  %v382_v31 = vsub.f32 0.0, %v381_v29  ;;  %v319_v15 = vmul.f32 %v914_v19, %v914_v19  ;;  %v380_v5 = vmax.f32 %v923_v24, 0.0  ;;  %p745_p11 = scmp.lt.s32.totalorder %s553_s23, %s553_s23 }
  0x42   :  { %628 = vpow2.f32 %v109_v21  ;;  %v428_v32 = vmul.f32 1.442695, %v427_v30  ;;  %v320_v23 = vmul.f32 %v916_v20, %v916_v20  ;;  %v321_v30 = vmul.f32 %v925_v25, %v925_v25 }
  0x43   :  { %630 = vpow2.f32 %v111_v22  ;;  %v383_v33 = vmul.f32 1.442695, %v382_v31  ;;  %vm407_vm2 = vcmask 1040384   ;;  %vm455_vm3 = vcmask 253952  }
  0x44   :  { %590 = vmatpush3.bf16.msra.mxu0 %v175_v28  ;;  %632 = vpow2.f32 %v428_v32  ;;  %vm181_vm4 = vcmask 261120  }
  0x45   :  { %634 = vpow2.f32 %v383_v33 }
  0x47   :  { %v621_v34 = vpop.eup %620 }
  0x48   :  { %v137_v37 = vmul.f32 0.6931472, %v621_v34 }
  0x49   :  { %v623_v36 = vpop.eup %622 }
  0x4a   :  { %v625_v38 = vpop.eup %624  ;;  %v113_v39 = vadd.f32 1.0, %v623_v36  ;;  %v138_v42 = vadd.f32 %v137_v37, %v134_v35  ;;  %v322_v35 = vmul.f32 %v927_v26, %v927_v26 }
  0x4b   :  { %v627_v40 = vpop.eup %626  ;;  %v114_v41 = vadd.f32 1.0, %v625_v38  ;;  %v162_v38 = vlaneseq }
  0x4c   :  { %v629_v43 = vpop.eup %628  ;;  %636 = vlog2.f32 %v113_v39  ;;  %v142_v44 = vmul.f32 0.6931472, %v627_v40 }
  0x4d   :  { %v631_v45 = vpop.eup %630  ;;  %638 = vlog2.f32 %v114_v41  ;;  %v115_v46 = vadd.f32 1.0, %v629_v43 }
  0x4e   :  { %v116_v47 = vadd.f32 1.0, %v631_v45  ;;  %v143_v48 = vsub.f32 %v138_v42, %v142_v44  ;;  %v633_v50 = vpop.eup %632  ;;  %v963_v45 = vand.u32 127, %v162_v38 }
  0x4f   :  { %640 = vlog2.f32 %v115_v46  ;;  %v635_v51 = vpop.eup %634  ;;  %v430_v53 = vadd.f32 1.0, %v633_v50 }
  0x50   :  { %642 = vlog2.f32 %v116_v47  ;;  %v145_v49 = vmul.f32 10.0, %v143_v48  ;;  %v385_v54 = vadd.f32 1.0, %v635_v51  ;;  %vm313_vm1 = vcmp.lt.s32.totalorder %v963_v45, 32 }
  0x51   :  { %644 = vrcp.f32 %v430_v53 }
  0x52   :  { %v146_v52 = vsub.f32 0.0, %v145_v49  ;;  %646 = vlog2.f32 %v385_v54 }
  0x54   :  { %v147_v55 = vmul.f32 1.442695, %v146_v52 }
  0x56   :  { %v637_v57 = vpop.eup %636  ;;  %648 = vpow2.f32 %v147_v55 }
  0x57   :  { %v639_v59 = vpop.eup %638  ;;  %v118_v60 = vmul.f32 0.6931472, %v637_v57 }
  0x58   :  { %v120_v61 = vmul.f32 0.6931472, %v639_v59 }
  0x59   :  { %v641_v63 = vpop.eup %640  ;;  %v125_v3 = vadd.f32 %v118_v60, %v93_v56 }
  0x5a   :  { %v643_v7 = vpop.eup %642  ;;  %v126_v8 = vadd.f32 %v120_v61, %v94_v58  ;;  %v122_v9 = vmul.f32 0.6931472, %v641_v63 }
  0x5b   :  { %v129_v10 = vmul.f32 %v125_v3, %v125_v3  ;;  %v331_v11 = vadd.f32 1e-07, %v125_v3  ;;  %v124_v1 = vmul.f32 0.6931472, %v643_v7  ;;  %v946_v16 = vpop.eup %644 }
  0x5c   :  { %v130_v12 = vmul.f32 %v126_v8, %v126_v8  ;;  %v332_v13 = vadd.f32 1e-07, %v126_v8  ;;  %v127_v14 = vadd.f32 %v122_v9, %v95_v62  ;;  %v647_v21 = vpop.eup %646  ;;  %v438_v19 = vadd.f32 1e-07, %v946_v16 }
  0x5d   :  { %650 = vlog2.f32 %v331_v11  ;;  %v128_v2 = vadd.f32 %v124_v1, %v96_v4  ;;  %v387_v29 = vmul.f32 0.6931472, %v647_v21  ;;  %v323_v32 = vadd.f32 %v319_v15, %v129_v10 }
  0x5e   :  { %v234_v17 = vpack.c.bf16 %v130_v12, %v129_v10  ;;  %652 = vlog2.f32 %v332_v13  ;;  %v131_v6 = vmul.f32 %v127_v14, %v127_v14  ;;  %v333_v18 = vadd.f32 1e-07, %v127_v14 }
  0x5f   :  { %v132_v22 = vmul.f32 %v128_v2, %v128_v2  ;;  %v334_v27 = vadd.f32 1e-07, %v128_v2  ;;  %v388_v33 = vadd.f32 %v387_v29, %v380_v5  ;;  %v955_v34 = vsub.f32 1.0, %v946_v16 }
  0x60   :  { %v649_v28 = vpop.eup %648  ;;  %596 = vmatpush3.bf16.msra.mxu1 %v234_v17  ;;  %654 = vlog2.f32 %v333_v18  ;;  %v324_v20 = vadd.f32 %v320_v23, %v130_v12  ;;  %v325_v37 = vadd.f32 %v321_v30, %v131_v6  ;;  %v327_v39 = vmul.f32 1.3888888, %v323_v32 }
  0x61   :  { %597 = vmatprep.subr.bf16.mxu1 %v799_v0  ;;  %v235_v24 = vpack.c.bf16 %v132_v22, %v131_v6  ;;  %v149_v31 = vadd.f32 1.0, %v649_v28  ;;  %656 = vlog2.f32 %v334_v27  ;;  %v378_v0 = vld [vmem:[%s1028_s3] sm:$0x1]  ;;  %v400_v36 = vadd.f32 1e-07, %v388_v33 }
  0x62   :  { %v443_v25 = vadd.f32 1e-07, %v955_v34  ;;  %v396_v40 = vmul.f32 %v388_v33, %v388_v33  ;;  %v397_v41 = vmul.f32 %v378_v0, %v378_v0  ;;  %v328_v43 = vmul.f32 1.3888888, %v324_v20 }
  0x63   :  { %658 = vrcp.f32 %v149_v31  ;;  %v326_v44 = vadd.f32 %v322_v35, %v132_v22  ;;  %v329_v47 = vmul.f32 1.3888888, %v325_v37  ;;  %v448_v61 = vmul.f32 -2.3025842, %v946_v16 }
  0x64   :  { %598 = vmatpush3.bf16.msra.mxu1 %v235_v24  ;;  %660 = vlog2.f32 %v438_v19  ;;  %v398_v51 = vadd.f32 %v397_v41, %v396_v40  ;;  %v967_v12 = vshrl.u32 %v162_v38, 7  ;;  %v449_v14 = vmul.f32 -0.1053604, %v955_v34  ;;  %v156_v41 = vld [vmem:[#allocation5] sm:$0xf] }
  0x65   :  { %662 = vlog2.f32 %v400_v36  ;;  %v330_v52 = vmul.f32 1.3888888, %v326_v44 }
  0x66   :  { %664 = vlog2.f32 %v443_v25  ;;  %v399_v4 = vmul.f32 1.3888888, %v398_v51  ;;  %v450_v31 = vadd.f32 %v449_v14, %v448_v61  ;;  %v164_v35 = vsub.s32 0, %v967_v12 }
  0x67   :  { %v651_v42 = vpop.eup %650 }
  0x68   :  { %v653_v26 = vpop.eup %652  ;;  %v336_v46 = vmul.f32 0.6931472, %v651_v42  ;;  %v157_v42 = vld [vmem:[#allocation5 + $0x4] sm:$0xf] }
  0x69   :  { %v338_v48 = vmul.f32 0.6931472, %v653_v26 }
  0x6a   :  { %v655_v49 = vpop.eup %654  ;;  %v343_v50 = vsub.f32 %v327_v39, %v336_v46 }
  0x6b   :  { %v340_v53 = vmul.f32 0.6931472, %v655_v49  ;;  %v344_v54 = vsub.f32 %v328_v43, %v338_v48  ;;  %v657_v55 = vpop.eup %656 }
  0x6c   :  { %v347_v56 = vadd.f32 -0.51082563, %v343_v50  ;;  %v342_v58 = vmul.f32 0.6931472, %v657_v55 }
  0x6d   :  { %v659_v57 = vpop.eup %658  ;;  %v345_v59 = vsub.f32 %v329_v47, %v340_v53  ;;  %v348_v60 = vadd.f32 -0.51082563, %v344_v54 }
  0x6e   :  { %v661_v62 = vpop.eup %660  ;;  %v152_v63 = vmul.f32 1.2, %v659_v57  ;;  %v571_v3 = vadd.f32 -0.5, %v347_v56  ;;  %v346_v7 = vsub.f32 %v330_v52, %v342_v58 }
  0x6f   :  { %v349_v8 = vadd.f32 -0.51082563, %v345_v59  ;;  %v572_v9 = vadd.f32 -0.5, %v348_v60  ;;  %v440_v10 = vmul.f32 0.6931472, %v661_v62  ;;  %v663_v11 = vpop.eup %662 }
  0x70   :  { %v153_v1 = vadd.f32 -0.1, %v152_v63  ;;  %v355_v13 = vsel %vm313_vm1, %v571_v3, 0.0  ;;  %v665_v2 = vpop.eup %664  ;;  %v350_v15 = vadd.f32 -0.51082563, %v346_v7 }
  0x71   :  { %v573_v5 = vadd.f32 -0.5, %v349_v8  ;;  %v356_v17 = vsel %vm313_vm1, %v572_v9, 0.0  ;;  %v402_v6 = vmul.f32 0.6931472, %v663_v11  ;;  %v441_v22 = vmul.f32 %v946_v16, %v440_v10 }
  0x72   :  { %v154_v18 = vmax.f32 %v153_v1, 0.0  ;;  %v359_v21 = vadd.f32 %v356_v17, %v355_v13  ;;  %v445_v23 = vmul.f32 0.6931472, %v665_v2  ;;  %v574_v27 = vadd.f32 -0.5, %v350_v15  ;;  %v472_v1 = vld [vmem:[%s1029_s4] sm:$0x1] }
  0x73   :  { %v357_v28 = vsel %vm313_vm1, %v573_v5, 0.0  ;;  %v403_v29 = vsub.f32 %v399_v4, %v402_v6  ;;  %v474_v13 = vand.u32 2147483647, %v472_v1  ;;  %v473_v6 = vmax.f32 %v472_v1, 0.0  ;;  %s740_s4 = scalar_lea.vmem %s553_s23, 128 }
  0x74   :  { %v155_v19 = vmin.f32 %v154_v18, 1.0  ;;  %v360_v24 = vadd.f32 %v359_v21, %v357_v28  ;;  %v446_v30 = vmul.f32 %v445_v23, %v955_v34  ;;  %v358_v32 = vsel %vm313_vm1, %v574_v27, 0.0  ;;  %p741_p10 = scmp.ne.s32.totalorder %s553_s23, %s740_s4  ;;  %p746_p12 = scmp.lt.s32.totalorder %s740_s4, %s740_s4 }
  0x75   :  { %v404_v33 = vadd.f32 -0.51082563, %v403_v29  ;;  %v475_v14 = vsub.f32 0.0, %v474_v13 }
  0x76   :  { %v158_v20 = vpack.c.bf16 %v155_v19, %v155_v19  ;;  %v361_v0 = vadd.f32 %v360_v24, %v358_v32  ;;  %v447_v16 = vadd.f32 %v446_v30, %v441_v22  ;;  %p747_p13 = por %p746_p12, %p745_p11 }
  0x77   :  { %v575_v36 = vadd.f32 -0.5, %v404_v33  ;;  %v476_v2 = vmul.f32 1.442695, %v475_v14 }
  0x78   :  { %v160_v25 = vpack.i.b16 %v158_v20, %v158_v20  ;;  %362 = vadd.xlane.f32.xlu0 %v361_v0  ;;  %v451_v37 = vsub.f32 %v447_v16, %v450_v31  ;;  %p748_p0 = pnand %p747_p13, %p741_p10 }
  0x79   :  { %v406_v38 = vsel %vm313_vm1, %v575_v36, 0.0  ;;  %666 = vpow2.f32 %v476_v2 }
  0x7a   :  { %v165_v34 = vrot.slane %v160_v25, %v164_v35  ;;  %v408_v39 = vsel %vm407_vm2, %v406_v38, 0.0  ;;  %v454_v40 = vsel %vm313_vm1, %v451_v37, 0.0 }
  0x7b   :  { %v456_v43 = vsel %vm455_vm3, %v454_v40, 0.0 }
  0x7c   :  { %v566_v44 = vcombine.low %v165_v34, %v165_v34  ;;  %409 = vadd.xlane.f32.xlu0 %v408_v39  ;;  %457 = vadd.xlane.f32.xlu1 %v456_v43 }
  0x7e   :  { %v170_v26 = vmul.bf16 %v566_v44, %v156_v41  ;;  %v171_v46 = vmul.bf16 %v566_v44, %v157_v42 }
  0x80   :  { %v232_v47 = vmul.bf16 %v170_v26, %v170_v26  ;;  %v233_v48 = vmul.bf16 %v171_v46, %v171_v46  ;;  %v567_v49 = vcombine.low %v170_v26, %v171_v46 }
  0x82   :  { %v569_v50 = vcombine.low %v232_v47, %v233_v48  ;;  %592 = vmatmul.mubr.msk.bf16.vlgmr.msra.gmra.mrb[0].mxu0 %vm181_vm4, %v567_v49 }
  0x83   :  { %v667_v15 = vpop.eup %666 }
  0x84   :  { %600 = vmatmul.mubr.msk.bf16.vlgmr.msra.gmra.mrb[0].mxu1 %vm181_vm4, %v569_v50  ;;  %v478_v5 = vadd.f32 1.0, %v667_v15 }
  0x86   :  { %668 = vlog2.f32 %v478_v5 }
  0x90   :  { %v669_v17 = vpop.eup %668 }
  0x91   :  { %v480_v18 = vmul.f32 0.6931472, %v669_v17 }
  0x93   :  { %v481_v21 = vadd.f32 %v480_v18, %v473_v6 }
  0x95   :  { %v495_v23 = vmul.f32 %v481_v21, %v481_v21 }
 0x105   :  { %v363_v51 = vpop.xlane.xlu0 %362 }
 0x106   :  { %v364_v52 = vrot.slane %v363_v51, 4 }
 0x108   :  { %v365_v53 = vadd.f32 %v364_v52, %v363_v51 }
 0x109   :  { %v410_v45 = vpop.xlane.xlu0 %409  ;;  %v458_v54 = vpop.xlane.xlu1 %457 }
 0x10a   :  { %v366_v55 = vrot.slane %v365_v53, 2  ;;  %v411_v56 = vrot.slane %v410_v45, 4  ;;  %v459_v57 = vrot.slane %v458_v54, 4 }
 0x10c   :  { %v412_v58 = vadd.f32 %v411_v56, %v410_v45  ;;  %v460_v59 = vadd.f32 %v459_v57, %v458_v54  ;;  %v367_v60 = vadd.f32 %v366_v55, %v365_v53 }
 0x10e   :  { %v413_v61 = vrot.slane %v412_v58, 2  ;;  %v461_v62 = vrot.slane %v460_v59, 2  ;;  %v368_v63 = vrot.slane %v367_v60, 1 }
 0x110   :  { %v414_v3 = vadd.f32 %v413_v61, %v412_v58  ;;  %v462_v4 = vadd.f32 %v461_v62, %v460_v59  ;;  %v369_v7 = vadd.f32 %v368_v63, %v367_v60 }
 0x112   :  { %603 = vpush %v369_v7  ;;  %v415_v8 = vrot.slane %v414_v3, 1  ;;  %v463_v9 = vrot.slane %v462_v4, 1 }
 0x114   :  { %v416_v10 = vadd.f32 %v415_v8, %v414_v3  ;;  %v464_v11 = vadd.f32 %v463_v9, %v462_v4 }
 0x116   :  { %605 = vpush %v416_v10 }
 0x117   :  { %607 = vpush %v464_v11 }
 0x143   :  { %s604_s15 = spop %603 }
 0x147   :  { %s606_s16 = spop %605 }
 0x148   :  { %s418_s17 = sadd.f32 %s606_s16, %s604_s15  ;;  %s608_s18 = spop %607 }
 0x14a   :  { %s466_s21 = sadd.f32 %s608_s18, %s418_s17 }
 0x14c   :  { %s530_s25 = smul.f32 0.0009765625, %s466_s21 }
 0x14e   :  { %v531_v22 = vstv %s530_s25 }
 0x14f   :  { %533 = vst [vmem:[#allocation12] sm:$0xff] %v531_v22 }
 0x150   :  { %751 = shalt.err (!%p748_p0)
}
 0x151   :  { %s752_s0 = scalar_lea.hbm %s1034_s9, 128 }
 0x152   :  { %p753_p1 = scmp.ne.s32.totalorder %s1034_s9, %s752_s0  ;;  %p756_p2 = scmp.lt.u32.totalorder %s752_s0, %s1034_s9 }
 0x154   :  { %p758_p3 = pnand %p756_p2, %p753_p1 }
 0x156   :  { %761 = shalt.err (!%p758_p3)
}
 0x157   :  { %555 = dma.vmem_to_hbm [thread:$0]  %s553_s23, 128, %s1034_s9, [#allocation13]   ;;  %v500_v27 = vrot.slane %v495_v23, %v164_v35  ;;  %v219_v28 = vpop.f32.mrb[0].mxu0  ;;  %v278_v19 = vpop.f32.mrb[0].mxu1  ;;  %v578_v16 = vld [vmem:[%s1032_s7] sm:$0xff]  }
 0x158   :  { %v593_v29 = vpop.f32.mrb[1].mxu0  ;;  %v601_v31 = vpop.f32.mrb[1].mxu1  ;;  %v576_v12 = vld [vmem:[%s1028_s3] ss:$0 sm:$0xff]  ;;  %v579_v25 = vunpack.c.l.bf16 %v578_v16  ;;  %v580_v34 = vunpack.c.h.bf16 %v578_v16  ;;  %s802_s7 = smov [#allocation11]  }
 0x159   :  { %v222_v24 = vpop.f32.mrb[2].mxu0  ;;  %v502_v30 = vadd.f32 %v500_v27, %v278_v19  ;;  %v281_v33 = vpop.f32.mrb[2].mxu1  ;;  %v491_v39 = vadd.f32 %v576_v12, %v219_v28  ;;  %s539_s5 = sshll.u32 %s802_s7, 4  ;;  %s540_s5 = int_to_ptr.vmem [resolvable:$true] %s539_s5 }
 0x15a   :  { %v594_v32 = vpop.f32.mrb[3].mxu0  ;;  %v503_v20 = vadd.f32 %v500_v27, %v281_v33  ;;  %v602_v0 = vpop.f32.mrb[3].mxu1  ;;  %v492_v48 = vadd.f32 %v576_v12, %v222_v24  ;;  %s762_s3 = scalar_lea.vmem %s540_s5, 256  ;;  %p767_p5 = scmp.lt.s32.totalorder %s540_s5, %s540_s5 }
 0x15b   :  { %670 = vrsqrt.f32 %v502_v30  ;;  %vm506_vm5 = vcmp.eq.f32.partialorder %v502_v30, inf  ;;  %v509_v38 = vand.u32 2147483648, %v502_v30  ;;  %vm508_vm6 = vcmp.eq.f32.partialorder %v502_v30, 0.0  ;;  %p763_p4 = scmp.ne.s32.totalorder %s540_s5, %s762_s3  ;;  %p768_p6 = scmp.lt.s32.totalorder %s762_s3, %s762_s3 }
 0x15c   :  { %672 = vrsqrt.f32 %v503_v20  ;;  %vm513_vm7 = vcmp.eq.f32.partialorder %v503_v20, inf  ;;  %v516_v43 = vand.u32 2147483648, %v503_v20  ;;  %vm515_vm8 = vcmp.eq.f32.partialorder %v503_v20, 0.0 }
 0x15d   :  { %p769_p7 = por %p768_p6, %p767_p5 }
 0x15f   :  { %p770_p8 = pnand %p769_p7, %p763_p4 }
 0x165   :  { %v671_v36 = vpop.eup %670 }
 0x166   :  { %v505_v35 = vmul.f32 %v671_v36, %v502_v30  ;;  %v673_v37 = vpop.eup %672 }
 0x167   :  { %v512_v41 = vmul.f32 %v673_v37, %v503_v20 }
 0x168   :  { %v507_v40 = vsel %vm506_vm5, %v502_v30, %v505_v35 }
 0x169   :  { %v510_v42 = vsel %vm508_vm6, %v509_v38, %v507_v40  ;;  %v514_v26 = vsel %vm513_vm7, %v503_v20, %v512_v41 }
 0x16a   :  { %v522_v44 = vmul.f32 %v579_v25, %v510_v42  ;;  %v517_v46 = vsel %vm515_vm8, %v516_v43, %v514_v26 }
 0x16b   :  { %v523_v49 = vmul.f32 %v580_v34, %v517_v46 }
 0x16c   :  { %v524_v47 = vadd.f32 %v522_v44, %v491_v39 }
 0x16d   :  { %v525_v50 = vadd.f32 %v523_v49, %v492_v48 }
 0x16e   :  { %526 = vst [vmem:[#allocation11] sm:$0xff] %v524_v47 }
 0x16f   :  { %527 = vst [vmem:[#allocation11 + $0x8] sm:$0xff] %v525_v50 }
 0x170   :  { %773 = shalt.err (!%p770_p8)
}
 0x171   :  { %s774_s14 = scalar_lea.hbm %s1033_s8, 256 }
 0x172   :  { %p775_p9 = scmp.ne.s32.totalorder %s1033_s8, %s774_s14  ;;  %p778_p10 = scmp.lt.u32.totalorder %s774_s14, %s1033_s8 }
 0x174   :  { %p780_p11 = pnand %p778_p10, %p775_p9 }
 0x176   :  { %783 = shalt.err (!%p780_p11)
}
 0x177   :  { %545 = dma.vmem_to_hbm [thread:$0]  %s540_s5, 256, %s1033_s8, [#allocation7], %s793_s19, %s793_s19, %s794_s20  }
 0x178   :  { %788 = dma.done.wait [#allocation7], 256  }
 0x179   :  { %789 = vsyncadd [#allocation7], 4294967040 }
 0x17a   :  { %790 = dma.done.wait [#allocation13], 128  }
 0x17b   :  { %791 = vsyncadd [#allocation13], 4294967168 }
 0x17c   :  { %562 = vsyncpa [#allocation6], 1 }
 0x17d   :  { %563 = vsyncpa [#allocation9], 1 }
 0x17e   :  { %564 = vsyncpa [#allocation7], 1 }
 0x17f   :  { %565 = vsyncpa [#allocation13], 1 }

</bundles_post_ra>
